<compile_context>
chip_gen: v7x
topology: tpu7x:2x2x1
jax: 0.10.0
libtpu: 0.0.40
codegen_flags: <defaults>
</compile_context>

<pallas_src>
import jax
import jax.numpy as jnp
from jax.experimental import pallas as pl
from jax.experimental.pallas import tpu as pltpu

BN_EPS = 1e-5


def _sigmoid(x):
    # Exact sigmoid: the kernel is DMA/MXU bound, so the VPU divide is free and
    # keeps the output strictly inside [0, 1].
    return 1.0 / (1.0 + jnp.exp(-x))


def _silu(x):
    return x * _sigmoid(x)


def _mlp_kernel(x_ref, w1_ref, b1_ref, w2_ref, b2_ref, w3_ref, vr_ref, c_ref,
                out_ref):
    # x_ref : (tb, d_in) f32        w1 : (d_in, H) bf16   b1 : (1, H) f32 (BN1 folded)
    # w2    : (H, O) bf16           b2 : (1, O) f32 (BN2 folded)
    # w3    : (1, O) f32            vr : (1, H) f32 = (wr @ w3)^T
    # c     : (1, 1) f32 = br @ w3 + b3
    # out   : (1, 1, tb) f32 lane-dense slab

    # Cast the streamed f32 tile to bf16 here (no extra HBM pass in the wrapper).
    x = x_ref[...].astype(jnp.bfloat16)

    # fc1 (+ folded BN1) + SiLU; dropout1 = identity in eval mode.
    h = jnp.dot(x, w1_ref[...], preferred_element_type=jnp.float32) + b1_ref[...]
    h = _silu(h)

    # fc2 (+ folded BN2) + SiLU; dropout2 = identity in eval mode.
    o = jnp.dot(h.astype(jnp.bfloat16), w2_ref[...],
                preferred_element_type=jnp.float32) + b2_ref[...]
    o = _silu(o)

    # fc3 and the residual branch folded through fc3: VPU multiply + XLU lane
    # reduce (avoids a degenerate N=1 MXU matmul and halves the 2nd matmul).
    y = (jnp.sum(o * w3_ref[...], axis=-1)
         + jnp.sum(h * vr_ref[...], axis=-1)
         + c_ref[0, 0])

    out_ref[...] = _sigmoid(y).reshape(out_ref.shape).astype(out_ref.dtype)


def _round_up(n, m):
    return ((n + m - 1) // m) * m


def _fold_bn(w, b, gamma, beta, mean, var):
    """Fold eval-mode BatchNorm1d (running stats) into the preceding Linear."""
    scale = gamma * jax.lax.rsqrt(var + BN_EPS)          # (1, n)
    return w * scale, (b - mean) * scale + beta


def _pick_batch_tile(b_pad, d_in, hidden, out_dim, batch_tile,
                     vmem_budget=36 * 1024 * 1024):
    """Largest sublane-aligned batch tile that fits the VMEM budget."""
    # Resident constants (the pipeline double-buffers them).
    const_bytes = 2 * (d_in * hidden + hidden * out_dim) * 2          # bf16 weights
    const_bytes += 2 * (3 * hidden + 3 * out_dim + 1) * 4             # f32 vectors
    # Per batch-row cost inside one tile.
    per_row = (2 * d_in * 4                    # f32 x tile, double-buffered
               + d_in * 2                      # bf16 cast of the x tile
               + (2 * hidden + 2 * out_dim) * 4  # h / o f32 intermediates (+slack)
               + 2 * 4)                        # output slab, double-buffered
    avail = max(vmem_budget - const_bytes, 8 * per_row)
    tb = min(batch_tile, b_pad, avail // per_row)
    tb = max(8, (tb // 8) * 8)
    # v7x has two TensorCores: make sure a moderate batch still yields >= 2
    # "parallel" grid tiles so both cores get work.
    if b_pad > 8 and tb >= b_pad:
        tb = max(8, _round_up(-(-b_pad // 2), 8))
    return tb


def metaiqa_forward(x, params, *, batch_tile=2048):
    """x: (B, C, H, W) float32.  params: dict of arrays (see init_params)."""
    B = x.shape[0]
    x2d = x.reshape(B, -1)                                # stays f32 (torch x.view)
    d_in = x2d.shape[1]

    # --- one-time wrapper-side folds (done by XLA, not per grid step) -------
    w1, b1 = _fold_bn(params["w1"], params["b1"],
                      params["g1"], params["be1"], params["m1"], params["v1"])
    w2, b2 = _fold_bn(params["w2"], params["b2"],
                      params["g2"], params["be2"], params["m2"], params["v2"])
    w3_col = params["w3"].reshape(-1, 1)                  # (O, 1)
    w3_row = params["w3"].reshape(1, -1)                  # (1, O) f32
    vr_row = (params["wr"] @ w3_col).reshape(1, -1)       # (1, H) f32, residual∘fc3
    c = params["br"] @ w3_col + params["b3"].reshape(1, 1)  # (1, 1) f32

    w1 = w1.astype(jnp.bfloat16)
    w2 = w2.astype(jnp.bfloat16)

    hidden = w1.shape[1]
    out_dim = w2.shape[1]

    # --- batch tiling: pad only to a sublane multiple, partial last tile ----
    b_pad = _round_up(B, 8)
    if b_pad != B:
        x2d = jnp.pad(x2d, ((0, b_pad - B), (0, 0)))

    tb = _pick_batch_tile(b_pad, d_in, hidden, out_dim, batch_tile)
    num_tiles = pl.cdiv(b_pad, tb)

    def const(shape):
        # Whole-array block, constant index -> stays resident across the grid.
        return pl.BlockSpec(shape, lambda i: (0,) * len(shape))

    out = pl.pallas_call(
        _mlp_kernel,
        out_shape=jax.ShapeDtypeStruct((num_tiles, 1, tb), jnp.float32),
        grid_spec=pl.GridSpec(
            grid=(num_tiles,),
            in_specs=[
                pl.BlockSpec((tb, d_in), lambda i: (i, 0)),   # x (streamed, f32)
                const((d_in, hidden)),                        # w1 (BN1 folded)
                const((1, hidden)),                           # b1
                const((hidden, out_dim)),                     # w2 (BN2 folded)
                const((1, out_dim)),                          # b2
                const((1, out_dim)),                          # w3 row
                const((1, hidden)),                           # residual∘fc3 row
                const((1, 1)),                                # scalar bias
            ],
            out_specs=pl.BlockSpec((1, 1, tb), lambda i: (i, 0, 0)),
        ),
        compiler_params=pltpu.CompilerParams(
            dimension_semantics=("parallel",),
            vmem_limit_bytes=48 * 1024 * 1024,
        ),
    )(x2d, w1, b1, w2, b2, w3_row, vr_row, c)

    # Lane-dense (num_tiles, 1, tb) slab -> (B, 1) column (contiguous reshape).
    return out.reshape(-1)[:B].reshape(B, 1)


def init_params(key, input_size, hidden_size, output_size):
    """Deterministic, PyTorch-style uniform(-1/sqrt(fan_in), 1/sqrt(fan_in)) init.

    Linear weights are stored transposed: (in_features, out_features).
    """
    ks = jax.random.split(key, 8)

    def lin(kw, kb, fan_in, fan_out):
        bound = 1.0 / jnp.sqrt(fan_in)
        w = jax.random.uniform(kw, (fan_in, fan_out), jnp.float32, -bound, bound)
        b = jax.random.uniform(kb, (1, fan_out), jnp.float32, -bound, bound)
        return w, b

    w1, b1 = lin(ks[0], ks[1], input_size, hidden_size)
    w2, b2 = lin(ks[2], ks[3], hidden_size, output_size)
    wr, br = lin(ks[4], ks[5], hidden_size, output_size)
    w3, b3 = lin(ks[6], ks[7], output_size, 1)

    def bn(n):
        return (
            jnp.ones((1, n), jnp.float32),   # gamma (weight)
            jnp.zeros((1, n), jnp.float32),  # beta (bias)
            jnp.zeros((1, n), jnp.float32),  # running_mean
            jnp.ones((1, n), jnp.float32),   # running_var
        )

    g1, be1, m1, v1 = bn(hidden_size)
    g2, be2, m2, v2 = bn(output_size)

    return dict(
        w1=w1, b1=b1, g1=g1, be1=be1, m1=m1, v1=v1,
        wr=wr, br=br, w2=w2, b2=b2,
        g2=g2, be2=be2, m2=m2, v2=v2,
        w3=w3, b3=b3,
    )


def reference_forward(x, p):
    """Pure-JAX f32 reference with the ORIGINAL (unfolded) eval-mode math."""
    B = x.shape[0]
    h = x.reshape(B, -1) @ p["w1"] + p["b1"]
    h = (h - p["m1"]) / jnp.sqrt(p["v1"] + BN_EPS) * p["g1"] + p["be1"]
    h = h * jax.nn.sigmoid(h)
    res = h @ p["wr"] + p["br"]
    o = h @ p["w2"] + p["b2"]
    o = (o - p["m2"]) / jnp.sqrt(p["v2"] + BN_EPS) * p["g2"] + p["be2"]
    o = o * jax.nn.sigmoid(o)
    o = o + res
    return jax.nn.sigmoid(o @ p["w3"] + p["b3"])


if __name__ == "__main__":
    # Small shapes consistent with the module: input_size = 3*16*16,
    # hidden_size = 256, output_size = 128.
    B, C, H, W = 2, 3, 16, 16
    input_size = C * H * W
    hidden_size = 256
    output_size = 128

    key = jax.random.PRNGKey(0)
    k_x, k_p = jax.random.split(key)
    x = jax.random.normal(k_x, (B, C, H, W), jnp.float32)
    params = init_params(k_p, input_size, hidden_size, output_size)

    fwd = jax.jit(lambda xx: metaiqa_forward(xx, params))
    out = jax.block_until_ready(fwd(x))
    ref = reference_forward(x, params)

    assert out.shape == (B, 1), out.shape
    # bf16 matmul inputs (f32 accumulation) vs. an f32 reference: compare with
    # an absolute tolerance appropriate for a sigmoid output in [0, 1].
    assert jnp.allclose(out, ref, atol=1e-2, rtol=0.0), (out, ref)

    print("KERNEL_OK")
</pallas_src>

<mosaic_0001>
module attributes {stable_mosaic.version = 11 : i64} {
  func.func @_mlp_kernel(%arg0: i32, %arg1: memref<8x768xf32, #tpu.memory_space<vmem>>, %arg2: memref<768x256xbf16, #tpu.memory_space<vmem>>, %arg3: memref<1x256xf32, #tpu.memory_space<vmem>>, %arg4: memref<256x128xbf16, #tpu.memory_space<vmem>>, %arg5: memref<1x128xf32, #tpu.memory_space<vmem>>, %arg6: memref<1x128xf32, #tpu.memory_space<vmem>>, %arg7: memref<1x256xf32, #tpu.memory_space<vmem>>, %arg8: memref<1x1xf32, #tpu.memory_space<vmem>>, %arg9: memref<1x1x8xf32, #tpu.memory_space<vmem>>) attributes {dimension_semantics = [#tpu.dimension_semantics<parallel>], iteration_bounds = array<i64: 1>, scalar_prefetch = 0 : i64, scratch_operands = 0 : i64, tpu.core_type = #tpu.core_type<tc>, window_params = [{transform_indices = @transform_0, window_bounds = array<i64: 8, 768>}, {pipeline_mode = #tpu.pipeline_mode<synchronous>, transform_indices = @transform_1, window_bounds = array<i64: 768, 256>}, {pipeline_mode = #tpu.pipeline_mode<synchronous>, transform_indices = @transform_2, window_bounds = array<i64: 1, 256>}, {pipeline_mode = #tpu.pipeline_mode<synchronous>, transform_indices = @transform_3, window_bounds = array<i64: 256, 128>}, {pipeline_mode = #tpu.pipeline_mode<synchronous>, transform_indices = @transform_4, window_bounds = array<i64: 1, 128>}, {pipeline_mode = #tpu.pipeline_mode<synchronous>, transform_indices = @transform_5, window_bounds = array<i64: 1, 128>}, {pipeline_mode = #tpu.pipeline_mode<synchronous>, transform_indices = @transform_6, window_bounds = array<i64: 1, 256>}, {pipeline_mode = #tpu.pipeline_mode<synchronous>, transform_indices = @transform_7, window_bounds = array<i64: 1, 1>}, {transform_indices = @transform_8, window_bounds = array<i64: 1, 1, 8>}]} {
    %c0 = arith.constant 0 : index
    %c0_0 = arith.constant 0 : index
    %0 = vector.load %arg1[%c0, %c0_0] : memref<8x768xf32, #tpu.memory_space<vmem>>, vector<8x768xf32>
    %1 = arith.truncf %0 : vector<8x768xf32> to vector<8x768xbf16>
    %c0_1 = arith.constant 0 : index
    %c0_2 = arith.constant 0 : index
    %2 = vector.load %arg2[%c0_1, %c0_2] : memref<768x256xbf16, #tpu.memory_space<vmem>>, vector<768x256xbf16>
    %cst = arith.constant dense<0.000000e+00> : vector<8x256xf32>
    %3 = tpu.matmul %1, %2, %cst {dimension_numbers = #tpu.dot_dimension_numbers<[1], [0], [0], [1], [0, 0, 1, 1], [], []>} : vector<8x768xbf16>, vector<768x256xbf16>, vector<8x256xf32> -> vector<8x256xf32>
    %c0_3 = arith.constant 0 : index
    %c0_4 = arith.constant 0 : index
    %4 = vector.load %arg3[%c0_3, %c0_4] : memref<1x256xf32, #tpu.memory_space<vmem>>, vector<1x256xf32>
    %5 = vector.broadcast %4 : vector<1x256xf32> to vector<8x256xf32>
    %6 = arith.addf %3, %5 : vector<8x256xf32>
    %cst_5 = arith.constant 0.000000e+00 : f32
    %7 = vector.broadcast %cst_5 : f32 to vector<8x256xf32>
    %8 = arith.subf %7, %6 : vector<8x256xf32>
    %9 = math.exp %8 : vector<8x256xf32>
    %cst_6 = arith.constant 1.000000e+00 : f32
    %10 = vector.broadcast %cst_6 : f32 to vector<8x256xf32>
    %11 = arith.addf %10, %9 : vector<8x256xf32>
    %cst_7 = arith.constant 1.000000e+00 : f32
    %12 = vector.broadcast %cst_7 : f32 to vector<8x256xf32>
    %13 = arith.divf %12, %11 : vector<8x256xf32>
    %14 = arith.mulf %6, %13 : vector<8x256xf32>
    %15 = arith.truncf %14 : vector<8x256xf32> to vector<8x256xbf16>
    %c0_8 = arith.constant 0 : index
    %c0_9 = arith.constant 0 : index
    %16 = vector.load %arg4[%c0_8, %c0_9] : memref<256x128xbf16, #tpu.memory_space<vmem>>, vector<256x128xbf16>
    %cst_10 = arith.constant dense<0.000000e+00> : vector<8x128xf32>
    %17 = tpu.matmul %15, %16, %cst_10 {dimension_numbers = #tpu.dot_dimension_numbers<[1], [0], [0], [1], [0, 0, 1, 1], [], []>} : vector<8x256xbf16>, vector<256x128xbf16>, vector<8x128xf32> -> vector<8x128xf32>
    %c0_11 = arith.constant 0 : index
    %c0_12 = arith.constant 0 : index
    %18 = vector.load %arg5[%c0_11, %c0_12] : memref<1x128xf32, #tpu.memory_space<vmem>>, vector<1x128xf32>
    %19 = vector.broadcast %18 : vector<1x128xf32> to vector<8x128xf32>
    %20 = arith.addf %17, %19 : vector<8x128xf32>
    %cst_13 = arith.constant 0.000000e+00 : f32
    %21 = vector.broadcast %cst_13 : f32 to vector<8x128xf32>
    %22 = arith.subf %21, %20 : vector<8x128xf32>
    %23 = math.exp %22 : vector<8x128xf32>
    %cst_14 = arith.constant 1.000000e+00 : f32
    %24 = vector.broadcast %cst_14 : f32 to vector<8x128xf32>
    %25 = arith.addf %24, %23 : vector<8x128xf32>
    %cst_15 = arith.constant 1.000000e+00 : f32
    %26 = vector.broadcast %cst_15 : f32 to vector<8x128xf32>
    %27 = arith.divf %26, %25 : vector<8x128xf32>
    %28 = arith.mulf %20, %27 : vector<8x128xf32>
    %c0_16 = arith.constant 0 : index
    %c0_17 = arith.constant 0 : index
    %29 = vector.load %arg6[%c0_16, %c0_17] : memref<1x128xf32, #tpu.memory_space<vmem>>, vector<1x128xf32>
    %30 = vector.broadcast %29 : vector<1x128xf32> to vector<8x128xf32>
    %31 = arith.mulf %28, %30 : vector<8x128xf32>
    %cst_18 = arith.constant dense<0.000000e+00> : vector<8xf32>
    %32 = vector.multi_reduction <add>, %31, %cst_18 [1] : vector<8x128xf32> to vector<8xf32>
    %c0_19 = arith.constant 0 : index
    %c0_20 = arith.constant 0 : index
    %33 = vector.load %arg7[%c0_19, %c0_20] : memref<1x256xf32, #tpu.memory_space<vmem>>, vector<1x256xf32>
    %34 = vector.broadcast %33 : vector<1x256xf32> to vector<8x256xf32>
    %35 = arith.mulf %14, %34 : vector<8x256xf32>
    %cst_21 = arith.constant dense<0.000000e+00> : vector<8xf32>
    %36 = vector.multi_reduction <add>, %35, %cst_21 [1] : vector<8x256xf32> to vector<8xf32>
    %37 = arith.addf %32, %36 : vector<8xf32>
    %c0_22 = arith.constant 0 : index
    %c0_23 = arith.constant 0 : index
    %38 = vector.load %arg8[%c0_22, %c0_23] : memref<1x1xf32, #tpu.memory_space<vmem>>, vector<1x1xf32>
    %39 = vector.extract %38[0, 0] : f32 from vector<1x1xf32>
    %40 = vector.broadcast %39 : f32 to vector<8xf32>
    %41 = arith.addf %37, %40 : vector<8xf32>
    %cst_24 = arith.constant 0.000000e+00 : f32
    %42 = vector.broadcast %cst_24 : f32 to vector<8xf32>
    %43 = arith.subf %42, %41 : vector<8xf32>
    %44 = math.exp %43 : vector<8xf32>
    %cst_25 = arith.constant 1.000000e+00 : f32
    %45 = vector.broadcast %cst_25 : f32 to vector<8xf32>
    %46 = arith.addf %45, %44 : vector<8xf32>
    %cst_26 = arith.constant 1.000000e+00 : f32
    %47 = vector.broadcast %cst_26 : f32 to vector<8xf32>
    %48 = arith.divf %47, %46 : vector<8xf32>
    %49 = vector.shape_cast %48 : vector<8xf32> to vector<1x1x8xf32>
    %c0_27 = arith.constant 0 : index
    %c0_28 = arith.constant 0 : index
    %c0_29 = arith.constant 0 : index
    %50 = vector.load %arg9[%c0_27, %c0_28, %c0_29] : memref<1x1x8xf32, #tpu.memory_space<vmem>>, vector<1x1x8xf32>
    tpu.vector_store %arg9[%c0_27, %c0_28, %c0_29], %49 {strides = array<i32>} : memref<1x1x8xf32, #tpu.memory_space<vmem>>, vector<1x1x8xf32>,
    return
  }
  func.func @transform_0(%arg0: i32) -> (i32, i32) {
    %c0_i32 = arith.constant 0 : i32
    %c0_i32_0 = arith.constant 0 : i32
    return %arg0, %c0_i32 : i32, i32
  }
  func.func @transform_1(%arg0: i32) -> (i32, i32) {
    %c0_i32 = arith.constant 0 : i32
    %c0_i32_0 = arith.constant 0 : i32
    %c0_i32_1 = arith.constant 0 : i32
    return %c0_i32, %c0_i32_0 : i32, i32
  }
  func.func @transform_2(%arg0: i32) -> (i32, i32) {
    %c0_i32 = arith.constant 0 : i32
    %c0_i32_0 = arith.constant 0 : i32
    %c0_i32_1 = arith.constant 0 : i32
    return %c0_i32, %c0_i32_0 : i32, i32
  }
  func.func @transform_3(%arg0: i32) -> (i32, i32) {
    %c0_i32 = arith.constant 0 : i32
    %c0_i32_0 = arith.constant 0 : i32
    %c0_i32_1 = arith.constant 0 : i32
    return %c0_i32, %c0_i32_0 : i32, i32
  }
  func.func @transform_4(%arg0: i32) -> (i32, i32) {
    %c0_i32 = arith.constant 0 : i32
    %c0_i32_0 = arith.constant 0 : i32
    %c0_i32_1 = arith.constant 0 : i32
    return %c0_i32, %c0_i32_0 : i32, i32
  }
  func.func @transform_5(%arg0: i32) -> (i32, i32) {
    %c0_i32 = arith.constant 0 : i32
    %c0_i32_0 = arith.constant 0 : i32
    %c0_i32_1 = arith.constant 0 : i32
    return %c0_i32, %c0_i32_0 : i32, i32
  }
  func.func @transform_6(%arg0: i32) -> (i32, i32) {
    %c0_i32 = arith.constant 0 : i32
    %c0_i32_0 = arith.constant 0 : i32
    %c0_i32_1 = arith.constant 0 : i32
    return %c0_i32, %c0_i32_0 : i32, i32
  }
  func.func @transform_7(%arg0: i32) -> (i32, i32) {
    %c0_i32 = arith.constant 0 : i32
    %c0_i32_0 = arith.constant 0 : i32
    %c0_i32_1 = arith.constant 0 : i32
    return %c0_i32, %c0_i32_0 : i32, i32
  }
  func.func @transform_8(%arg0: i32) -> (i32, i32, i32) {
    %c0_i32 = arith.constant 0 : i32
    %c0_i32_0 = arith.constant 0 : i32
    %c0_i32_1 = arith.constant 0 : i32
    return %arg0, %c0_i32, %c0_i32_0 : i32, i32, i32
  }
}

</mosaic_0001>

<bundles_post_ra>
// kernel: _lambda_.1
= control target key start
LH: loop header
LB: loop body
LE: loop exit
PB: predicated region body
PF: predicated region fallthrough
CT: control target
= control target key end

     0   :  { %vm999_vm0 = vcmask 57344   ;;  %s1751_s1 = inlined_call_operand.vmem [shape: bf16[768,256], index: 1, kind: input, shape index: {}]   ;;  %s1752_s0 = inlined_call_operand.vmem [shape: f32[8,768], index: 0, kind: input, shape index: {}]   ;;  %s1753_s3 = inlined_call_operand.vmem [shape: bf16[256,128], index: 3, kind: input, shape index: {}]   ;;  %s1754_s2 = inlined_call_operand.vmem [shape: f32[1,256], index: 2, kind: input, shape index: {}]   ;;  %s1755_s6 = inlined_call_operand.vmem [shape: f32[1,256], index: 6, kind: input, shape index: {}]   ;;  %s1756_s7 = inlined_call_operand.<no memory space> [shape: f32[1,1], index: 7, kind: input, shape index: {}]   ;;  %s1757_s4 = inlined_call_operand.vmem [shape: f32[1,128], index: 4, kind: input, shape index: {}]   ;;  %s1758_s5 = inlined_call_operand.vmem [shape: f32[1,128], index: 5, kind: input, shape index: {}]   ;;  %s1759_s8 = inlined_call_operand.vmem [shape: f32[1,1,8], index: 8, kind: output, shape index: {}]  }
   0x1   :  { %v1151_v0 = vld [vmem:[%s1751_s1 + $0x104] ss:$8 sps:$4 sm:$0xff]   ;;  %v1153_v1 = vld [vmem:[%s1751_s1 + $0x100] ss:$8 sps:$4 sm:$0xff]   ;;  %v1154_v2 = vld [vmem:[%s1751_s1 + $0x114] ss:$8 sps:$4 sm:$0xff]  }
   0x2   :  { %673 = vmatprep.subr.bf16.mxu0 %v1151_v0  ;;  %v1156_v3 = vld [vmem:[%s1751_s1 + $0x110] ss:$8 sps:$4 sm:$0xff]   ;;  %v1157_v4 = vld [vmem:[%s1751_s1 + $0x124] ss:$8 sps:$4 sm:$0xff]   ;;  %v1159_v5 = vld [vmem:[%s1751_s1 + $0x120] ss:$8 sps:$4 sm:$0xff]  }
   0x3   :  { %674 = vmatpush1.bf16.msra.mxu0 %v1153_v1  ;;  %v1160_v6 = vld [vmem:[%s1751_s1 + $0x134] ss:$8 sps:$4 sm:$0xff]   ;;  %v1162_v7 = vld [vmem:[%s1751_s1 + $0x130] ss:$8 sps:$4 sm:$0xff]   ;;  %v1163_v8 = vld [vmem:[%s1751_s1 + $0x144] ss:$8 sps:$4 sm:$0xff]  }
   0x4   :  { %675 = vmatprep.subr.bf16.mxu0 %v1154_v2  ;;  %v1165_v9 = vld [vmem:[%s1751_s1 + $0x140] ss:$8 sps:$4 sm:$0xff]   ;;  %v1166_v10 = vld [vmem:[%s1751_s1 + $0x154] ss:$8 sps:$4 sm:$0xff]   ;;  %v1168_v11 = vld [vmem:[%s1751_s1 + $0x150] ss:$8 sps:$4 sm:$0xff]  }
   0x5   :  { %v1169_v12 = vld [vmem:[%s1751_s1 + $0x164] ss:$8 sps:$4 sm:$0xff]   ;;  %v1198_v14 = vld [vmem:[%s1751_s1] ss:$8 sps:$4 sm:$0xff]   ;;  %v1172_v16 = vld [vmem:[%s1751_s1 + $0x174] ss:$8 sps:$4 sm:$0xff]  }
   0x6   :  { %v1196_v13 = vld [vmem:[%s1751_s1 + $0x4] ss:$8 sps:$4 sm:$0xff]   ;;  %v1171_v15 = vld [vmem:[%s1751_s1 + $0x160] ss:$8 sps:$4 sm:$0xff]   ;;  %v1202_v17 = vld [vmem:[%s1751_s1 + $0x14] ss:$8 sps:$4 sm:$0xff]  }
   0x7   :  { %676 = vmatpush1.bf16.msra.mxu0 %v1156_v3  ;;  %632 = vmatprep.subr.bf16.mxu1 %v1196_v13  ;;  %v1204_v18 = vld [vmem:[%s1751_s1 + $0x10] ss:$8 sps:$4 sm:$0xff]   ;;  %v1208_v22 = vld [vmem:[%s1751_s1 + $0x24] ss:$8 sps:$4 sm:$0xff]   ;;  %v1210_v23 = vld [vmem:[%s1751_s1 + $0x20] ss:$8 sps:$4 sm:$0xff]  }
   0x8   :  { %677 = vmatprep.subr.bf16.mxu0 %v1157_v4  ;;  %633 = vmatpush1.bf16.msra.mxu1 %v1198_v14  ;;  %v35_v19 = vld [vmem:[%s1752_s0 + $0x18] sm:$0xff]  ;;  %v1175_v24 = vld [vmem:[%s1751_s1 + $0x184] ss:$8 sps:$4 sm:$0xff]   ;;  %v1177_v26 = vld [vmem:[%s1751_s1 + $0x180] ss:$8 sps:$4 sm:$0xff]  }
   0x9   :  { %v1174_v20 = vld [vmem:[%s1751_s1 + $0x170] ss:$8 sps:$4 sm:$0xff]   ;;  %634 = vmatprep.subr.bf16.mxu1 %v1202_v17  ;;  %v41_v21 = vpack.c.bf16 %v35_v19, %v35_v19  ;;  %v1214_v25 = vld [vmem:[%s1751_s1 + $0x34] ss:$8 sps:$4 sm:$0xff]   ;;  %v1220_v29 = vld [vmem:[%s1751_s1 + $0x44] ss:$8 sps:$4 sm:$0xff]  }
   0xa   :  { %v1216_v27 = vld [vmem:[%s1751_s1 + $0x30] ss:$8 sps:$4 sm:$0xff]   ;;  %v1178_v28 = vld [vmem:[%s1751_s1 + $0x194] ss:$8 sps:$4 sm:$0xff]   ;;  %v1222_v31 = vld [vmem:[%s1751_s1 + $0x40] ss:$8 sps:$4 sm:$0xff]  }
   0xb   :  { %678 = vmatpush1.bf16.msra.mxu0 %v1159_v5  ;;  %705 = vmatprep.mubr.bf16.mxu0 %v41_v21  ;;  %v1180_v30 = vld [vmem:[%s1751_s1 + $0x190] ss:$8 sps:$4 sm:$0xff]   ;;  %v1181_v32 = vld [vmem:[%s1751_s1 + $0x1a4] ss:$8 sps:$4 sm:$0xff]   ;;  %v1226_v33 = vld [vmem:[%s1751_s1 + $0x54] ss:$8 sps:$4 sm:$0xff]  }
   0xc   :  { %679 = vmatprep.subr.bf16.mxu0 %v1160_v6  ;;  %635 = vmatpush1.bf16.msra.mxu1 %v1204_v18  ;;  %v1183_v34 = vld [vmem:[%s1751_s1 + $0x1a0] ss:$8 sps:$4 sm:$0xff]   ;;  %v1228_v35 = vld [vmem:[%s1751_s1 + $0x50] ss:$8 sps:$4 sm:$0xff]   ;;  %v1184_v36 = vld [vmem:[%s1751_s1 + $0x1b4] ss:$8 sps:$4 sm:$0xff]  }
   0xd   :  { %636 = vmatprep.subr.bf16.mxu1 %v1208_v22  ;;  %v1232_v37 = vld [vmem:[%s1751_s1 + $0x64] ss:$8 sps:$4 sm:$0xff]   ;;  %v1186_v38 = vld [vmem:[%s1751_s1 + $0x1b0] ss:$8 sps:$4 sm:$0xff]   ;;  %v1234_v39 = vld [vmem:[%s1751_s1 + $0x60] ss:$8 sps:$4 sm:$0xff]  }
   0xe   :  { %v1187_v40 = vld [vmem:[%s1751_s1 + $0x1c4] ss:$8 sps:$4 sm:$0xff]   ;;  %v1238_v41 = vld [vmem:[%s1751_s1 + $0x74] ss:$8 sps:$4 sm:$0xff]   ;;  %v1189_v42 = vld [vmem:[%s1751_s1 + $0x1c0] ss:$8 sps:$4 sm:$0xff]  }
   0xf   :  { %680 = vmatpush1.bf16.msra.mxu0 %v1162_v7  ;;  %v1240_v43 = vld [vmem:[%s1751_s1 + $0x70] ss:$8 sps:$4 sm:$0xff]   ;;  %v1190_v44 = vld [vmem:[%s1751_s1 + $0x1d4] ss:$8 sps:$4 sm:$0xff]   ;;  %v1244_v45 = vld [vmem:[%s1751_s1 + $0x84] ss:$8 sps:$4 sm:$0xff]  }
  0x10   :  { %681 = vmatprep.subr.bf16.mxu0 %v1163_v8  ;;  %637 = vmatpush1.bf16.msra.mxu1 %v1210_v23  ;;  %v1192_v46 = vld [vmem:[%s1751_s1 + $0x1d0] ss:$8 sps:$4 sm:$0xff]   ;;  %v1246_v47 = vld [vmem:[%s1751_s1 + $0x80] ss:$8 sps:$4 sm:$0xff]   ;;  %v1193_v48 = vld [vmem:[%s1751_s1 + $0x1e4] ss:$8 sps:$4 sm:$0xff]  }
  0x11   :  { %638 = vmatprep.subr.bf16.mxu1 %v1214_v25  ;;  %v1250_v49 = vld [vmem:[%s1751_s1 + $0x94] ss:$8 sps:$4 sm:$0xff]   ;;  %v1195_v50 = vld [vmem:[%s1751_s1 + $0x1e0] ss:$8 sps:$4 sm:$0xff]   ;;  %v1252_v51 = vld [vmem:[%s1751_s1 + $0x90] ss:$8 sps:$4 sm:$0xff]  }
  0x12   :  { %v1199_v52 = vld [vmem:[%s1751_s1 + $0x1f4] ss:$8 sps:$4 sm:$0xff]   ;;  %v1256_v53 = vld [vmem:[%s1751_s1 + $0xa4] ss:$8 sps:$4 sm:$0xff]   ;;  %v1201_v54 = vld [vmem:[%s1751_s1 + $0x1f0] ss:$8 sps:$4 sm:$0xff]  }
  0x13   :  { %682 = vmatpush1.bf16.msra.mxu0 %v1165_v9  ;;  %v34_v55 = vld [vmem:[%s1752_s0 + $0x10] sm:$0xff]  ;;  %v1258_v56 = vld [vmem:[%s1751_s1 + $0xa0] ss:$8 sps:$4 sm:$0xff]   ;;  %v1207_v57 = vld [vmem:[%s1751_s1 + $0x204] ss:$8 sps:$4 sm:$0xff]  }
  0x14   :  { %683 = vmatprep.subr.bf16.mxu0 %v1166_v10  ;;  %639 = vmatpush1.bf16.msra.mxu1 %v1216_v27  ;;  %v1262_v58 = vld [vmem:[%s1751_s1 + $0xb4] ss:$8 sps:$4 sm:$0xff]   ;;  %v1205_v59 = vld [vmem:[%s1751_s1 + $0x200] ss:$8 sps:$4 sm:$0xff]   ;;  %v40_v60 = vpack.c.bf16 %v34_v55, %v34_v55  ;;  %v1264_v62 = vld [vmem:[%s1751_s1 + $0xb0] ss:$8 sps:$4 sm:$0xff]  }
  0x15   :  { %640 = vmatprep.subr.bf16.mxu1 %v1220_v29  ;;  %v1213_v61 = vld [vmem:[%s1751_s1 + $0x214] ss:$8 sps:$4 sm:$0xff]   ;;  %v33_v63 = vld [vmem:[%s1752_s0 + $0x8] sm:$0xff]  ;;  %v1211_v4 = vld [vmem:[%s1751_s1 + $0x210] ss:$8 sps:$4 sm:$0xff]  }
  0x16   :  { %v1268_v0 = vld [vmem:[%s1751_s1 + $0xc4] ss:$8 sps:$4 sm:$0xff]   ;;  %v39_v1 = vpack.c.bf16 %v33_v63, %v33_v63  ;;  %v1270_v5 = vld [vmem:[%s1751_s1 + $0xc0] ss:$8 sps:$4 sm:$0xff]   ;;  %v1274_v7 = vld [vmem:[%s1751_s1 + $0xd4] ss:$8 sps:$4 sm:$0xff]  }
  0x17   :  { %684 = vmatpush1.bf16.msra.mxu0 %v1168_v11  ;;  %v37_v2 = vld [vmem:[%s1752_s0 + $0x28] sm:$0xff]  ;;  %v1276_v9 = vld [vmem:[%s1751_s1 + $0xd0] ss:$8 sps:$4 sm:$0xff]   ;;  %v1225_v10 = vld [vmem:[%s1751_s1 + $0x234] ss:$8 sps:$4 sm:$0xff]  }
  0x18   :  { %685 = vmatprep.subr.bf16.mxu0 %v1169_v12  ;;  %641 = vmatpush1.bf16.msra.mxu1 %v1222_v31  ;;  %v43_v3 = vpack.c.bf16 %v37_v2, %v37_v2  ;;  %v1219_v6 = vld [vmem:[%s1751_s1 + $0x224] ss:$8 sps:$4 sm:$0xff]   ;;  %v1217_v8 = vld [vmem:[%s1751_s1 + $0x220] ss:$8 sps:$4 sm:$0xff]   ;;  %v1223_v12 = vld [vmem:[%s1751_s1 + $0x230] ss:$8 sps:$4 sm:$0xff]  }
  0x19   :  { %642 = vmatprep.subr.bf16.mxu1 %v1226_v33  ;;  %664 = vmatprep.mubr.bf16.mxu1 %v39_v1  ;;  %v1280_v11 = vld [vmem:[%s1751_s1 + $0xe4] ss:$8 sps:$4 sm:$0xff]   ;;  %v1282_v13 = vld [vmem:[%s1751_s1 + $0xe0] ss:$8 sps:$4 sm:$0xff]   ;;  %v1288_v17 = vld [vmem:[%s1751_s1 + $0xf0] ss:$8 sps:$4 sm:$0xff]  }
  0x1a   :  { %v1231_v14 = vld [vmem:[%s1751_s1 + $0x244] ss:$8 sps:$4 sm:$0xff]   ;;  %v1237_v19 = vld [vmem:[%s1751_s1 + $0x254] ss:$8 sps:$4 sm:$0xff]   ;;  %v1235_v21 = vld [vmem:[%s1751_s1 + $0x250] ss:$8 sps:$4 sm:$0xff]  }
  0x1b   :  { %686 = vmatpush1.bf16.msra.mxu0 %v1171_v15  ;;  %v1286_v15 = vld [vmem:[%s1751_s1 + $0xf4] ss:$8 sps:$4 sm:$0xff]   ;;  %v32_v18 = vld [vmem:[%s1752_s0] sm:$0xff]  ;;  %v1247_v25 = vld [vmem:[%s1751_s1 + $0x270] ss:$8 sps:$4 sm:$0xff]  }
  0x1c   :  { %687 = vmatprep.subr.bf16.mxu0 %v1172_v16  ;;  %643 = vmatpush1.bf16.msra.mxu1 %v1228_v35  ;;  %v1229_v16 = vld [vmem:[%s1751_s1 + $0x240] ss:$8 sps:$4 sm:$0xff]   ;;  %v1243_v22 = vld [vmem:[%s1751_s1 + $0x264] ss:$8 sps:$4 sm:$0xff]   ;;  %v1259_v29 = vld [vmem:[%s1751_s1 + $0x290] ss:$8 sps:$4 sm:$0xff]  }
  0x1d   :  { %644 = vmatprep.subr.bf16.mxu1 %v1232_v37  ;;  %v1241_v23 = vld [vmem:[%s1751_s1 + $0x260] ss:$8 sps:$4 sm:$0xff]   ;;  %v1271_v33 = vld [vmem:[%s1751_s1 + $0x2b0] ss:$8 sps:$4 sm:$0xff]  }
  0x1e   :  { %v1253_v27 = vld [vmem:[%s1751_s1 + $0x280] ss:$8 sps:$4 sm:$0xff]   ;;  %v1283_v37 = vld [vmem:[%s1751_s1 + $0x2d0] ss:$8 sps:$4 sm:$0xff]  }
  0x1f   :  { %688 = vmatpush1.bf16.msra.mxu0 %v1174_v20  ;;  %v38_v20 = vpack.c.bf16 %v32_v18, %v32_v18  ;;  %v1265_v31 = vld [vmem:[%s1751_s1 + $0x2a0] ss:$8 sps:$4 sm:$0xff]  }
  0x20   :  { %689 = vmatprep.subr.bf16.mxu0 %v1175_v24  ;;  %645 = vmatpush1.bf16.msra.mxu1 %v1234_v39  ;;  %v1249_v24 = vld [vmem:[%s1751_s1 + $0x274] ss:$8 sps:$4 sm:$0xff]   ;;  %v1277_v35 = vld [vmem:[%s1751_s1 + $0x2c0] ss:$8 sps:$4 sm:$0xff]  }
  0x21   :  { %646 = vmatprep.subr.bf16.mxu1 %v1238_v41  ;;  %v1289_v39 = vld [vmem:[%s1751_s1 + $0x2e0] ss:$8 sps:$4 sm:$0xff]   ;;  %v1292_v41 = vld [vmem:[%s1751_s1 + $0x2f0] ss:$8 sps:$4 sm:$0xff]  }
  0x22   :  { %v1306_v55 = vld [vmem:[%s1753_s3 + $0x28] sm:$0xff]  }
  0x23   :  { %690 = vmatpush1.bf16.msra.mxu0 %v1177_v26  ;;  %v1255_v26 = vld [vmem:[%s1751_s1 + $0x284] ss:$8 sps:$4 sm:$0xff]  }
  0x24   :  { %691 = vmatprep.subr.bf16.mxu0 %v1178_v28  ;;  %647 = vmatpush1.bf16.msra.mxu1 %v1240_v43  ;;  %v1261_v28 = vld [vmem:[%s1751_s1 + $0x294] ss:$8 sps:$4 sm:$0xff]  }
  0x25   :  { %648 = vmatprep.subr.bf16.mxu1 %v1244_v45  ;;  %v1296_v45 = vld [vmem:[%s1753_s3] sm:$0xff]  }
  0x27   :  { %692 = vmatpush1.bf16.msra.mxu0 %v1180_v30  ;;  %v1267_v30 = vld [vmem:[%s1751_s1 + $0x2a4] ss:$8 sps:$4 sm:$0xff]  }
  0x28   :  { %693 = vmatprep.subr.bf16.mxu0 %v1181_v32  ;;  %649 = vmatpush1.bf16.msra.mxu1 %v1246_v47  ;;  %v1273_v32 = vld [vmem:[%s1751_s1 + $0x2b4] ss:$8 sps:$4 sm:$0xff]   ;;  %v1298_v47 = vld [vmem:[%s1753_s3 + $0x8] sm:$0xff]  }
  0x29   :  { %650 = vmatprep.subr.bf16.mxu1 %v1250_v49  ;;  %v1300_v49 = vld [vmem:[%s1753_s3 + $0x10] sm:$0xff]  }
  0x2b   :  { %694 = vmatpush1.bf16.msra.mxu0 %v1183_v34  ;;  %v1279_v34 = vld [vmem:[%s1751_s1 + $0x2c4] ss:$8 sps:$4 sm:$0xff]  }
  0x2c   :  { %695 = vmatprep.subr.bf16.mxu0 %v1184_v36  ;;  %651 = vmatpush1.bf16.msra.mxu1 %v1252_v51  ;;  %v1285_v36 = vld [vmem:[%s1751_s1 + $0x2d4] ss:$8 sps:$4 sm:$0xff]  }
  0x2d   :  { %652 = vmatprep.subr.bf16.mxu1 %v1256_v53  ;;  %v1302_v51 = vld [vmem:[%s1753_s3 + $0x18] sm:$0xff]   ;;  %v1304_v53 = vld [vmem:[%s1753_s3 + $0x20] sm:$0xff]  }
  0x2f   :  { %696 = vmatpush1.bf16.msra.mxu0 %v1186_v38  ;;  %v1291_v38 = vld [vmem:[%s1751_s1 + $0x2e4] ss:$8 sps:$4 sm:$0xff]  }
  0x30   :  { %697 = vmatprep.subr.bf16.mxu0 %v1187_v40  ;;  %653 = vmatpush1.bf16.msra.mxu1 %v1258_v56  ;;  %v1294_v40 = vld [vmem:[%s1751_s1 + $0x2f4] ss:$8 sps:$4 sm:$0xff]  }
  0x31   :  { %654 = vmatprep.subr.bf16.mxu1 %v1262_v58  ;;  %v1307_v56 = vld [vmem:[%s1753_s3 + $0x70] sm:$0xff]   ;;  %v1309_v58 = vld [vmem:[%s1753_s3 + $0x78] sm:$0xff]  }
  0x33   :  { %698 = vmatpush1.bf16.msra.mxu0 %v1189_v42  ;;  %v36_v42 = vld [vmem:[%s1752_s0 + $0x20] sm:$0xff] }
  0x34   :  { %699 = vmatprep.subr.bf16.mxu0 %v1190_v44  ;;  %655 = vmatpush1.bf16.msra.mxu1 %v1264_v62  ;;  %v42_v43 = vpack.c.bf16 %v36_v42, %v36_v42  ;;  %v1295_v44 = vld [vmem:[%s1753_s3 + $0x40] sm:$0xff]  }
  0x35   :  { %656 = vmatprep.subr.bf16.mxu1 %v1268_v0  ;;  %v142_v0 = vlaneseq }
  0x37   :  { %700 = vmatpush1.bf16.msra.mxu0 %v1192_v46  ;;  %v1297_v46 = vld [vmem:[%s1753_s3 + $0x48] sm:$0xff]   ;;  %v1727_v1 = vshrl.u32 %v142_v0, 7 }
  0x38   :  { %701 = vmatprep.subr.bf16.mxu0 %v1193_v48  ;;  %657 = vmatpush1.bf16.msra.mxu1 %v1270_v5  ;;  %v1299_v48 = vld [vmem:[%s1753_s3 + $0x50] sm:$0xff]  }
  0x39   :  { %658 = vmatprep.subr.bf16.mxu1 %v1274_v7  ;;  %v144_v2 = vsub.s32 0, %v1727_v1 }
  0x3b   :  { %702 = vmatpush1.bf16.msra.mxu0 %v1195_v50  ;;  %v1301_v50 = vld [vmem:[%s1753_s3 + $0x58] sm:$0xff]  }
  0x3c   :  { %703 = vmatprep.subr.bf16.mxu0 %v1199_v52  ;;  %659 = vmatpush1.bf16.msra.mxu1 %v1276_v9  ;;  %v1303_v52 = vld [vmem:[%s1753_s3 + $0x60] sm:$0xff]  }
  0x3d   :  { %660 = vmatprep.subr.bf16.mxu1 %v1280_v11 }
  0x3f   :  { %704 = vmatpush1.bf16.msra.mxu0 %v1201_v54  ;;  %v1305_v54 = vld [vmem:[%s1753_s3 + $0x68] sm:$0xff]  }
  0x40   :  { %714 = vmatprep.subr.bf16.mxu0 %v1207_v57  ;;  %661 = vmatpush1.bf16.msra.mxu1 %v1282_v13  ;;  %v1308_v57 = vld [vmem:[%s1753_s3 + $0x30] sm:$0xff]  }
  0x41   :  { %662 = vmatprep.subr.bf16.mxu1 %v1286_v15 }
  0x42   :  { %706 = vmatmul.mubr.bf16.vlgmr.msra.gmra.mrb[0].mxu0 %v40_v60 }
  0x43   :  { %715 = vmatpush1.bf16.msra.mxu0 %v1205_v59  ;;  %746 = vmatprep.mubr.bf16.mxu0 %v43_v3  ;;  %v1310_v59 = vld [vmem:[%s1753_s3 + $0x38] sm:$0xff]   ;;  %v140_v3 = vld [vmem:[%s1754_s2] sm:$0x3] }
  0x44   :  { %716 = vmatprep.subr.bf16.mxu0 %v1213_v61  ;;  %663 = vmatpush1.bf16.msra.mxu1 %v1288_v17  ;;  %v145_v5 = vrot.slane %v140_v3, %v144_v2 }
  0x45   :  { %1119 = vmatprep.subr.bf16.mxu1 %v1295_v44 }
  0x47   :  { %717 = vmatpush1.bf16.msra.mxu0 %v1211_v4  ;;  %665 = vmatmul.mubr.bf16.vlgmr.msra.gmra.mrb[0].mxu1 %v38_v20  ;;  %v148_v4 = vsub.s32 1, %v1727_v1 }
  0x48   :  { %718 = vmatprep.subr.bf16.mxu0 %v1219_v6  ;;  %1120 = vmatpush3.bf16.msra.mxu1 %v1296_v45 }
  0x49   :  { %1121 = vmatprep.subr.bf16.mxu1 %v1297_v46  ;;  %v149_v6 = vrot.slane %v140_v3, %v148_v4 }
  0x4b   :  { %719 = vmatpush1.bf16.msra.mxu0 %v1217_v8 }
  0x4c   :  { %720 = vmatprep.subr.bf16.mxu0 %v1225_v10  ;;  %1122 = vmatpush3.bf16.msra.mxu1 %v1298_v47 }
  0x4d   :  { %1123 = vmatprep.subr.bf16.mxu1 %v1299_v48 }
  0x4f   :  { %721 = vmatpush1.bf16.msra.mxu0 %v1223_v12 }
  0x50   :  { %722 = vmatprep.subr.bf16.mxu0 %v1231_v14  ;;  %1124 = vmatpush3.bf16.msra.mxu1 %v1300_v49  ;;  %v1118_v49 = vld [vmem:[%s1758_s5] ss:$0 sm:$0xff] }
  0x51   :  { %1125 = vmatprep.subr.bf16.mxu1 %v1301_v50 }
  0x53   :  { %723 = vmatpush1.bf16.msra.mxu0 %v1229_v16 }
  0x54   :  { %724 = vmatprep.subr.bf16.mxu0 %v1237_v19  ;;  %1126 = vmatpush3.bf16.msra.mxu1 %v1302_v51 }
  0x55   :  { %1127 = vmatprep.subr.bf16.mxu1 %v1303_v52 }
  0x57   :  { %725 = vmatpush1.bf16.msra.mxu0 %v1235_v21 }
  0x58   :  { %726 = vmatprep.subr.bf16.mxu0 %v1243_v22  ;;  %1128 = vmatpush3.bf16.msra.mxu1 %v1304_v53 }
  0x59   :  { %1129 = vmatprep.subr.bf16.mxu1 %v1305_v54 }
  0x5b   :  { %727 = vmatpush1.bf16.msra.mxu0 %v1241_v23  ;;  %v963_v23 = vld [vmem:[%s1755_s6] sm:$0x3] }
  0x5c   :  { %728 = vmatprep.subr.bf16.mxu0 %v1249_v24  ;;  %1130 = vmatpush3.bf16.msra.mxu1 %v1306_v55  ;;  %v968_v24 = vrot.slane %v963_v23, %v144_v2 }
  0x5d   :  { %1131 = vmatprep.subr.bf16.mxu1 %v1307_v56 }
  0x5f   :  { %729 = vmatpush1.bf16.msra.mxu0 %v1247_v25 }
  0x60   :  { %730 = vmatprep.subr.bf16.mxu0 %v1255_v26  ;;  %1132 = vmatpush3.bf16.msra.mxu1 %v1308_v57  ;;  %v972_v26 = vrot.slane %v963_v23, %v148_v4 }
  0x61   :  { %1133 = vmatprep.subr.bf16.mxu1 %v1309_v58 }
  0x63   :  { %731 = vmatpush1.bf16.msra.mxu0 %v1253_v27 }
  0x64   :  { %732 = vmatprep.subr.bf16.mxu0 %v1261_v28  ;;  %1134 = vmatpush3.bf16.msra.mxu1 %v1310_v59 }
  0x67   :  { %733 = vmatpush1.bf16.msra.mxu0 %v1259_v29 }
  0x68   :  { %734 = vmatprep.subr.bf16.mxu0 %v1267_v30 }
  0x6b   :  { %735 = vmatpush1.bf16.msra.mxu0 %v1265_v31 }
  0x6c   :  { %736 = vmatprep.subr.bf16.mxu0 %v1273_v32 }
  0x6f   :  { %737 = vmatpush1.bf16.msra.mxu0 %v1271_v33 }
  0x70   :  { %738 = vmatprep.subr.bf16.mxu0 %v1279_v34 }
  0x73   :  { %739 = vmatpush1.bf16.msra.mxu0 %v1277_v35  ;;  %v13_v35 = vstv %s1756_s7 }
  0x74   :  { %740 = vmatprep.subr.bf16.mxu0 %v1285_v36  ;;  %14 = vst [vmem:[#allocation2] sm:$0x1] %v13_v35 }
  0x77   :  { %741 = vmatpush1.bf16.msra.mxu0 %v1283_v37 }
  0x78   :  { %742 = vmatprep.subr.bf16.mxu0 %v1291_v38  ;;  %v1101_v38 = vld [vmem:[%s1757_s4] ss:$0 sm:$0xff] }
  0x7b   :  { %743 = vmatpush1.bf16.msra.mxu0 %v1289_v39  ;;  %v981_v36 = vld [vmem:[#allocation2] sm:$0x1] }
  0x7c   :  { %744 = vmatprep.subr.bf16.mxu0 %v1294_v40  ;;  %1149 = vpush %v981_v36 }
  0x7f   :  { %745 = vmatpush1.bf16.msra.mxu0 %v1292_v41 }
  0x82   :  { %747 = vmatmul.mubr.bf16.vlgmr.msra.gmra.mrb[0].mxu0 %v42_v43 }
  0xad   :  { %s1150_s4 = spop %1149 }
  0xae   :  { %v983_v54 = vstv %s1150_s4 }
 0x11a   :  { %v666_v60 = vpop.f32.mrb[0].mxu1 }
 0x11b   :  { %v668_v61 = vpop.f32.mrb[1].mxu1  ;;  %v667_v7 = vadd.f32 %v666_v60, %v145_v5 }
 0x11c   :  { %v670_v62 = vpop.f32.mrb[2].mxu1  ;;  %v669_v8 = vadd.f32 %v668_v61, %v149_v6  ;;  %v993_v61 = vand.u32 127, %v142_v0 }
 0x11d   :  { %v671_v63 = vpop.f32.mrb[3].mxu1 }
 0x11e   :  { %v996_v62 = vsub.s32 %v993_v61, %v1727_v1 }
 0x155   :  { %v748_v9 = vpop.f32.mrb[0].mxu0 }
 0x156   :  { %v1142_v10 = vadd.f32 %v748_v9, %v667_v7  ;;  %v750_v11 = vpop.f32.mrb[1].mxu0 }
 0x157   :  { %v1144_v12 = vadd.f32 %v750_v11, %v669_v8  ;;  %v752_v13 = vpop.f32.mrb[2].mxu0 }
 0x158   :  { %v755_v14 = vsub.f32 0.0, %v1142_v10  ;;  %v753_v15 = vpop.f32.mrb[3].mxu0 }
 0x159   :  { %v756_v16 = vsub.f32 0.0, %v1144_v12 }
 0x15a   :  { %v757_v17 = vmul.f32 1.442695, %v755_v14 }
 0x15b   :  { %v759_v18 = vmul.f32 1.442695, %v756_v16 }
 0x15c   :  { %1311 = vpow2.f32 %v757_v17 }
 0x15d   :  { %1313 = vpow2.f32 %v759_v18 }
 0x166   :  { %v1312_v19 = vpop.eup %1311 }
 0x167   :  { %v1314_v20 = vpop.eup %1313  ;;  %v761_v21 = vadd.f32 1.0, %v1312_v19 }
 0x168   :  { %v762_v22 = vadd.f32 1.0, %v1314_v20 }
 0x169   :  { %1315 = vrcp.f32 %v761_v21 }
 0x16a   :  { %1317 = vrcp.f32 %v762_v22 }
 0x173   :  { %v1316_v25 = vpop.eup %1315 }
 0x174   :  { %v1318_v27 = vpop.eup %1317  ;;  %v767_v28 = vmul.f32 %v1316_v25, %v1142_v10 }
 0x175   :  { %v768_v29 = vmul.f32 %v1318_v27, %v1144_v12 }
 0x176   :  { %v975_v30 = vmul.f32 %v968_v24, %v767_v28  ;;  %v769_v33 = vpack.c.bf16 %v767_v28, %v767_v28 }
 0x177   :  { %v770_v31 = vpack.c.bf16 %v768_v29, %v768_v29  ;;  %v976_v32 = vmul.f32 %v972_v26, %v768_v29 }
 0x179   :  { %938 = vmatprep.mubr.bf16.mxu1 %v770_v31  ;;  %v977_v34 = vadd.f32 %v976_v32, %v975_v30 }
 0x17a   :  { %939 = vmatmul.mubr.bf16.vlgmr.msra.gmra.mrb[4].mxu1 %v769_v33 }
 0x24d   :  { %v1135_v37 = vpop.f32.mrb[4].mxu1 }
 0x24e   :  { %v1136_v39 = vpop.f32.mrb[5].mxu1 }
 0x24f   :  { %v1137_v40 = vadd.f32 %v1136_v39, %v1135_v37  ;;  %v1138_v41 = vpop.f32.mrb[6].mxu1 }
 0x250   :  { %v1139_v42 = vpop.f32.mrb[7].mxu1 }
 0x251   :  { %v941_v43 = vadd.f32 %v1137_v40, %v1101_v38 }
 0x253   :  { %v946_v44 = vsub.f32 0.0, %v941_v43 }
 0x255   :  { %v947_v45 = vmul.f32 1.442695, %v946_v44 }
 0x257   :  { %1319 = vpow2.f32 %v947_v45 }
 0x261   :  { %v1320_v46 = vpop.eup %1319 }
 0x262   :  { %v949_v47 = vadd.f32 1.0, %v1320_v46 }
 0x264   :  { %1321 = vrcp.f32 %v949_v47 }
 0x26e   :  { %v1322_v48 = vpop.eup %1321 }
 0x26f   :  { %v952_v50 = vmul.f32 %v1322_v48, %v941_v43 }
 0x271   :  { %v960_v51 = vmul.f32 %v1118_v49, %v952_v50 }
 0x273   :  { %961 = vadd.xlane.f32.xlu0 %v960_v51 }
 0x277   :  { %978 = vadd.xlane.f32.xlu0 %v977_v34 }
 0x300   :  { %v962_v52 = vpop.xlane.xlu0 %961 }
 0x304   :  { %v979_v53 = vpop.xlane.xlu0 %978 }
 0x305   :  { %v980_v55 = vadd.f32 %v979_v53, %v962_v52 }
 0x307   :  { %v984_v56 = vadd.f32 %v983_v54, %v980_v55 }
 0x309   :  { %v985_v57 = vsub.f32 0.0, %v984_v56 }
 0x30b   :  { %v986_v58 = vmul.f32 1.442695, %v985_v57 }
 0x30d   :  { %1323 = vpow2.f32 %v986_v58 }
 0x317   :  { %v1324_v59 = vpop.eup %1323 }
 0x318   :  { %v988_v60 = vadd.f32 1.0, %v1324_v59 }
 0x31a   :  { %1325 = vrcp.f32 %v988_v60 }
 0x324   :  { %v1326_v63 = vpop.eup %1325 }
 0x325   :  { %v997_v2 = vrot.slane %v1326_v63, %v996_v62 }
 0x327   :  { %1000 = vst.msk [vmem:[%s1759_s8] sm:$0x1] %vm999_vm0, %v997_v2 }

</bundles_post_ra>
